<compile_context>
chip_gen: v5e
topology: v5e:2x2
jax: 0.10.0
libtpu: 0.0.40
codegen_flags: <defaults>
</compile_context>

<pallas_src>
import math

import jax
import jax.numpy as jnp
from jax.experimental import pallas as pl
from jax.experimental.pallas import tpu as pltpu


# Conservative, generation-portable VMEM numbers (v7x has only 64 MiB physical
# per TensorCore; v5e's scoped default is 16 MiB of 128 MiB physical).
_VMEM_TILE_BUDGET = 40 * 1024 * 1024   # budget used when sizing the node tile
_VMEM_LIMIT_BYTES = 48 * 1024 * 1024   # raises v5e/v6e/v7x scoped defaults safely


def timeconv_kernel(k_ref, x_ref, o_ref):
    """k_ref: (T*Co, T*Ci) f32; x_ref: (T*Ci, nb) io dtype; o_ref: (T*Co, nb)."""
    x = x_ref[...].astype(jnp.float32)                     # f32 compute
    h = jnp.dot(k_ref[...], x, preferred_element_type=jnp.float32)
    act = jnp.where(h > 0.0, h, 0.01 * h)                  # LeakyReLU(0.01), f32
    o_ref[...] = (x + act).astype(o_ref.dtype)             # residual (Ci == Co)


def _build_spectral_matrix(weights1, T):
    """Fold rfft -> complex channel mix -> irfft into a (T*Co, T*Ci) real matrix."""
    Ci, Co, M, _ = weights1.shape
    assert M <= T // 2 + 1, "modes must not exceed the rfft bin count (T//2 + 1)"

    wr = weights1[..., 0]                                   # (Ci, Co, M)
    wi = weights1[..., 1]                                   # (Ci, Co, M)

    t = jnp.arange(T, dtype=jnp.float32)
    m = jnp.arange(M, dtype=jnp.float32)
    diff = t[:, None] - t[None, :]                          # (T, T): t_out - t_in
    phase = (2.0 * math.pi / T) * m[:, None, None] * diff[None, :, :]   # (M, T, T)

    # irfft(norm="backward") synthesis weights: DC (and Nyquist) 1/T, interior 2/T.
    c = jnp.full((M,), 2.0 / T, dtype=jnp.float32)
    c = c.at[0].set(1.0 / T)
    if T % 2 == 0 and M > T // 2:
        c = c.at[T // 2].set(1.0 / T)

    cosp = jnp.cos(phase) * c[:, None, None]                # (M, T, T)
    sinp = jnp.sin(phase) * c[:, None, None]                # (M, T, T)

    # K[t_out, co, t_in, ci]
    K = (jnp.einsum('mts,iom->tosi', cosp, wr)
         - jnp.einsum('mts,iom->tosi', sinp, wi))
    return K.reshape(T * Co, T * Ci).astype(jnp.float32)


def _round_down(v, m):
    return (v // m) * m


def _choose_node_tile(N, t_ci, t_co, io_bytes, k_bytes):
    """Pick a lane tile: big (amortize per-step cost), 128-aligned, VMEM-safe,
    and leaving >=2 grid steps for large N (v7x megacore sharding)."""
    if N <= 512:
        return N                                   # single full-width block
    nb = max(512, _round_down(N // 8, 128))        # ~8 grid steps
    nb = min(nb, max(128, _round_down(N // 2, 128)))   # keep >=2 steps
    per_node = 2 * (t_ci + t_co) * io_bytes        # double-buffered x + y tiles
    avail = max(_VMEM_TILE_BUDGET - 2 * k_bytes, 0)  # K is double-buffered by default
    nb_vmem = _round_down(avail // per_node, 128)
    if nb_vmem >= 128:
        nb = min(nb, nb_vmem)
    return min(nb, 8192)


def time_conv_forward_slab(x_slab, K, *, io_dtype=jnp.bfloat16):
    """Apply the folded TimeConv to a sublane-dense (T*C, N) slab.

    x_slab: (T*Ci, N); K: (T*Co, T*Ci) float32 (from _build_spectral_matrix).
    Returns (T*Co, N) in io_dtype.  Stacked EGNO layers should chain this
    function directly (slab stays in this layout) to avoid per-layer HBM
    round-trip transposes around the pallas_call.
    """
    TCo, TCi = K.shape
    TC, N = x_slab.shape
    assert TC == TCi, "slab sublane extent must equal T * in_ch"

    x_slab = x_slab.astype(io_dtype)
    io_bytes = jnp.dtype(io_dtype).itemsize
    k_bytes = int(K.size) * 4

    nb = _choose_node_tile(N, TCi, TCo, io_bytes, k_bytes)
    grid = (pl.cdiv(N, nb),)                       # ragged last block is fine

    cost = pl.CostEstimate(
        flops=2 * TCo * TCi * N,
        transcendentals=0,
        bytes_accessed=io_bytes * (TCi * N + TCo * N) + 4 * TCo * TCi,
    )

    return pl.pallas_call(
        timeconv_kernel,
        out_shape=jax.ShapeDtypeStruct((TCo, N), io_dtype),
        grid=grid,
        in_specs=[
            # K is the same (tiny) block every step; Pallas keeps it resident.
            # TODO(synk): when T*C grows enough that K's default double-buffer
            # matters in VMEM, add pipeline_mode=pl.Buffered(1) here (and
            # consider pl.Buffered(3) on the x/out specs if DMA stays exposed).
            pl.BlockSpec((TCo, TCi), lambda n: (0, 0)),
            pl.BlockSpec((TCi, nb), lambda n: (0, n)),      # x slab tile
        ],
        out_specs=pl.BlockSpec((TCo, nb), lambda n: (0, n)),
        compiler_params=pltpu.CompilerParams(
            dimension_semantics=("parallel",),
            vmem_limit_bytes=_VMEM_LIMIT_BYTES,
        ),
        cost_estimate=cost,
    )(K.astype(jnp.float32), x_slab)


def time_conv_forward(x, weights1, *, io_dtype=jnp.bfloat16):
    """TimeConv forward at the module boundary.

    x:        (T, N, C) float32
    weights1: (C_in, C_out, modes, 2) float32  (real/imag stacked, as in PyTorch)
    returns:  (T, N, C_out), same dtype as x
    """
    T, N, Ci = x.shape
    _, Co, M, _ = weights1.shape
    assert Ci == Co, "residual x + out requires in_ch == out_ch"
    assert M <= T // 2 + 1, "modes must not exceed T//2 + 1"

    K = _build_spectral_matrix(weights1, T)                 # (T*Co, T*Ci), f32

    # Boundary layout change only: (T, N, C) -> (T*C, N).  When TimeConv layers
    # are stacked, keep activations in slab layout and call
    # time_conv_forward_slab repeatedly instead of paying this per layer.
    x_slab = jnp.transpose(x, (0, 2, 1)).reshape(T * Ci, N)
    y_slab = time_conv_forward_slab(x_slab, K, io_dtype=io_dtype)

    return jnp.transpose(y_slab.reshape(T, Co, N), (0, 2, 1)).astype(x.dtype)


def timeconv_reference(x, weights1):
    """Pure-JAX reference mirroring the PyTorch module (for validation)."""
    T = x.shape[0]
    modes = weights1.shape[2]
    w_cplx = weights1[..., 0] + 1j * weights1[..., 1]           # (Ci, Co, modes)
    x_ft = jnp.fft.rfft(x.astype(jnp.float32), axis=0)          # (T//2+1, N, Ci)
    out_ft = jnp.einsum('mni,iom->mno', x_ft[:modes], w_cplx)   # (modes, N, Co)
    h = jnp.fft.irfft(out_ft, n=T, axis=0)                      # (T, N, Co)
    out = jnp.where(h > 0, h, 0.01 * h)                         # LeakyReLU(0.01)
    return x + out


if __name__ == "__main__":
    # Small shapes consistent with TimeConv: x is (T, N, C); in_ch == out_ch.
    T, C, modes = 8, 4, 3

    key = jax.random.PRNGKey(0)
    kx, kw = jax.random.split(key)
    scale = 1.0 / (C * C)
    weights1 = scale * jax.random.uniform(kw, (C, C, modes, 2), dtype=jnp.float32)

    # Case 1: f32 I/O path, small N (single grid step) -- tight tolerance.
    x1 = jax.random.normal(kx, (T, 256, C), dtype=jnp.float32)
    y1 = jax.block_until_ready(time_conv_forward(x1, weights1, io_dtype=jnp.float32))
    ref1 = timeconv_reference(x1, weights1)
    assert y1.shape == ref1.shape
    assert jnp.allclose(y1, ref1, rtol=1e-3, atol=1e-3), "f32 path mismatch"

    # Case 2: default bf16 streams + ragged node count (pl.cdiv grid path).
    x2 = jax.random.normal(jax.random.fold_in(kx, 1), (T, 1000, C), dtype=jnp.float32)
    y2 = jax.block_until_ready(time_conv_forward(x2, weights1))
    ref2 = timeconv_reference(x2, weights1)
    assert y2.shape == ref2.shape
    assert jnp.allclose(y2.astype(jnp.float32), ref2, rtol=3e-2, atol=3e-2), \
        "bf16 path mismatch"

    print("KERNEL_OK")
</pallas_src>

<mosaic_0001>
module attributes {stable_mosaic.version = 11 : i64} {
  func.func @timeconv_kernel(%arg0: i32, %arg1: memref<32x32xf32, #tpu.memory_space<vmem>>, %arg2: memref<32x256xf32, #tpu.memory_space<vmem>>, %arg3: memref<32x256xf32, #tpu.memory_space<vmem>>) attributes {dimension_semantics = [#tpu.dimension_semantics<parallel>], iteration_bounds = array<i64: 1>, scalar_prefetch = 0 : i64, scratch_operands = 0 : i64, tpu.core_type = #tpu.core_type<tc>, window_params = [{pipeline_mode = #tpu.pipeline_mode<synchronous>, transform_indices = @transform_0, window_bounds = array<i64: 32, 32>}, {transform_indices = @transform_1, window_bounds = array<i64: 32, 256>}, {transform_indices = @transform_2, window_bounds = array<i64: 32, 256>}]} {
    %c0 = arith.constant 0 : index
    %c0_0 = arith.constant 0 : index
    %0 = vector.load %arg2[%c0, %c0_0] : memref<32x256xf32, #tpu.memory_space<vmem>>, vector<32x256xf32>
    %c0_1 = arith.constant 0 : index
    %c0_2 = arith.constant 0 : index
    %1 = vector.load %arg1[%c0_1, %c0_2] : memref<32x32xf32, #tpu.memory_space<vmem>>, vector<32x32xf32>
    %cst = arith.constant dense<0.000000e+00> : vector<32x256xf32>
    %2 = tpu.matmul %1, %0, %cst {dimension_numbers = #tpu.dot_dimension_numbers<[1], [0], [0], [1], [0, 0, 1, 1], [], []>} : vector<32x32xf32>, vector<32x256xf32>, vector<32x256xf32> -> vector<32x256xf32>
    %cst_3 = arith.constant 0.000000e+00 : f32
    %3 = vector.broadcast %cst_3 : f32 to vector<32x256xf32>
    %4 = arith.cmpf ogt, %2, %3 : vector<32x256xf32>
    %cst_4 = arith.constant 0.00999999977 : f32
    %5 = vector.broadcast %cst_4 : f32 to vector<32x256xf32>
    %6 = arith.mulf %5, %2 : vector<32x256xf32>
    %7 = arith.select %4, %2, %6 : vector<32x256xi1>, vector<32x256xf32>
    %8 = arith.addf %0, %7 : vector<32x256xf32>
    %c0_5 = arith.constant 0 : index
    %c0_6 = arith.constant 0 : index
    %9 = vector.load %arg3[%c0_5, %c0_6] : memref<32x256xf32, #tpu.memory_space<vmem>>, vector<32x256xf32>
    tpu.vector_store %arg3[%c0_5, %c0_6], %8 {strides = array<i32>} : memref<32x256xf32, #tpu.memory_space<vmem>>, vector<32x256xf32>,
    return
  }
  func.func @transform_0(%arg0: i32) -> (i32, i32) {
    %c0_i32 = arith.constant 0 : i32
    %c0_i32_0 = arith.constant 0 : i32
    %c0_i32_1 = arith.constant 0 : i32
    return %c0_i32, %c0_i32_0 : i32, i32
  }
  func.func @transform_1(%arg0: i32) -> (i32, i32) {
    %c0_i32 = arith.constant 0 : i32
    %c0_i32_0 = arith.constant 0 : i32
    return %c0_i32, %arg0 : i32, i32
  }
  func.func @transform_2(%arg0: i32) -> (i32, i32) {
    %c0_i32 = arith.constant 0 : i32
    %c0_i32_0 = arith.constant 0 : i32
    return %c0_i32, %arg0 : i32, i32
  }
}

</mosaic_0001>

<bundles_post_ra>
// kernel: tpu_custom_call.1
= control target key start
LH: loop header
LB: loop body
LE: loop exit
PB: predicated region body
PF: predicated region fallthrough
CT: control target
= control target key end

     0   :  { %7 = vsyncpa [#allocation3], 0  ;;  %s348_s0 = inlined_call_operand.hbm [shape: f32[32,32], index: 0, kind: input, shape index: {}]   ;;  %s349_s1 = inlined_call_operand.hbm [shape: f32[32,256], index: 1, kind: input, shape index: {}]   ;;  %s350_s2 = inlined_call_operand.hbm [shape: f32[32,256], index: 2, kind: output, shape index: {}]  }
   0x1   :  { %8 = vsyncpa [#allocation6], 0 }
   0x2   :  { %9 = vsyncpa [#allocation4], 0  ;;  %s14_s11 = sshll.u32 %s348_s0, 4  ;;  %s288_s12 = smov [#allocation2]   ;;  %s15_s11 = int_to_ptr.hbm [resolvable:$true] %s14_s11 }
   0x3   :  { %s16_s13 = sshll.u32 %s288_s12, 4  ;;  %s27_s16 = sshll.u32 %s349_s1, 4  ;;  %s17_s13 = int_to_ptr.vmem [resolvable:$true] %s16_s13  ;;  %s28_s16 = int_to_ptr.hbm [resolvable:$true] %s27_s16 }
   0x4   :  { %s289_s17 = smov 128   ;;  %s290_s18 = smov 8  }
   0x5   :  { %22 = dma.hbm_to_vmem [thread:$0]  %s15_s11, 512, %s17_s13, [#allocation3], %s289_s17, %s289_s17, %s290_s18  }
   0x6   :  { %s291_s19 = smov [#allocation5]   ;;  %s292_s21 = smov 256  }
   0x7   :  { %s29_s20 = sshll.u32 %s291_s19, 4  ;;  %s293_s22 = smov 16   ;;  %s30_s20 = int_to_ptr.vmem [resolvable:$true] %s29_s20 }
   0x8   :  { %35 = dma.hbm_to_vmem [thread:$0]  %s28_s16, 1024, %s30_s20, [#allocation6], %s292_s21, %s292_s21, %s293_s22  }
   0x9   :  { %282 = dma.done.wait [#allocation3], 512  }
   0xa   :  { %283 = vsyncadd [#allocation3], 4294966784 }
   0xb   :  { %284 = dma.done.wait [#allocation6], 1024  }
   0xc   :  { %285 = vsyncadd [#allocation6], 4294966272  ;;  %v319_v0 = vld [vmem:[#allocation5 + $0x30] sm:$0xff]  ;;  %v321_v1 = vld [vmem:[#allocation5 + $0x38] sm:$0xff]  ;;  %vm56_vm0 = vcmask 261120   ;;  %s294_s0 = smov [#allocation7]  }
   0xd   :  { %v48_v2 = vld [vmem:[#allocation5 + $0x20] sm:$0xff]  ;;  %195 = vmatpush.msra.mxu2 %v319_v0  ;;  %199 = vmatpush.msra.mxu3 %v321_v1  ;;  %v49_v3 = vld [vmem:[#allocation5 + $0x28] sm:$0xff]  ;;  %v326_v4 = vld [vmem:[#allocation5 + $0x10] sm:$0xff]  ;;  %s171_s1 = sshll.u32 %s294_s0, 4  ;;  %s173_s25 = sshll.u32 %s350_s2, 4  ;;  %s172_s1 = int_to_ptr.vmem [resolvable:$true] %s171_s1  ;;  %s174_s25 = int_to_ptr.hbm [resolvable:$true] %s173_s25 }
   0xe   :  { %81 = vmatpush.msra.mxu0 %v319_v0  ;;  %110 = vmatpush.msra.mxu1 %v321_v1  ;;  %v47_v5 = vld [vmem:[#allocation5 + $0x18] sm:$0xff]  ;;  %v44_v6 = vld [vmem:[#allocation5] sm:$0xff]  ;;  %v45_v7 = vld [vmem:[#allocation5 + $0x8] sm:$0xff] }
   0xf   :  { %196 = vmatpush.msra.mxu2 %v48_v2  ;;  %200 = vmatpush.msra.mxu3 %v49_v3  ;;  %v54_v8 = vld [vmem:[#allocation2 + $0x10] sm:$0xff]  ;;  %v52_v9 = vld [vmem:[#allocation2] sm:$0xff]  ;;  %v55_v10 = vld [vmem:[#allocation2 + $0x18] sm:$0xff] }
  0x10   :  { %82 = vmatpush.msra.mxu0 %v48_v2  ;;  %111 = vmatpush.msra.mxu1 %v49_v3  ;;  %v53_v11 = vld [vmem:[#allocation2 + $0x8] sm:$0xff] }
  0x11   :  { %197 = vmatpush.msra.mxu2 %v326_v4  ;;  %201 = vmatpush.msra.mxu3 %v47_v5 }
  0x12   :  { %83 = vmatpush.msra.mxu0 %v326_v4  ;;  %112 = vmatpush.msra.mxu1 %v47_v5 }
  0x13   :  { %198 = vmatpush.msra.mxu2 %v44_v6  ;;  %202 = vmatpush.msra.mxu3 %v45_v7 }
  0x14   :  { %189 = vmatmul.msk.f32.vlgmr.msra.gmra.mxu2 %vm56_vm0, %v54_v8  ;;  %193 = vmatmul.msk.f32.vlgmr.msra.gmra.mxu3 %vm56_vm0, %v54_v8 }
  0x15   :  { %84 = vmatpush.msra.mxu0 %v44_v6  ;;  %113 = vmatpush.msra.mxu1 %v45_v7 }
  0x16   :  { %187 = vmatmul.msk.f32.vlgmr.msra.gmra.mxu0 %vm56_vm0, %v52_v9  ;;  %191 = vmatmul.msk.f32.vlgmr.msra.gmra.mxu1 %vm56_vm0, %v52_v9 }
  0x1c   :  { %190 = vmatmul.msk.f32.gmra.mxu2 %vm56_vm0, %v55_v10  ;;  %194 = vmatmul.msk.f32.gmra.mxu3 %vm56_vm0, %v55_v10 }
  0x1e   :  { %188 = vmatmul.msk.f32.gmra.mxu0 %vm56_vm0, %v53_v11  ;;  %192 = vmatmul.msk.f32.gmra.mxu1 %vm56_vm0, %v53_v11 }
  0x93   :  { %v86_v12 = vpop.f32.mrf.mxu0  ;;  %v115_v13 = vpop.f32.mrf.mxu1 }
  0x94   :  { %vm127_vm1 = vcmp.gt.f32.partialorder %v86_v12, 0.0  ;;  %v135_v14 = vmul.f32 0.01, %v86_v12  ;;  %vm128_vm2 = vcmp.gt.f32.partialorder %v115_v13, 0.0  ;;  %v136_v15 = vmul.f32 0.01, %v115_v13 }
  0x96   :  { %v143_v16 = vsel %vm127_vm1, %v86_v12, %v135_v14  ;;  %v144_v17 = vsel %vm128_vm2, %v115_v13, %v136_v15 }
  0x97   :  { %v151_v18 = vadd.f32 %v143_v16, %v44_v6  ;;  %v152_v19 = vadd.f32 %v144_v17, %v45_v7  ;;  %v92_v20 = vpop.f32.mrf.mxu2  ;;  %v121_v21 = vpop.f32.mrf.mxu3 }
  0x98   :  { %vm131_vm3 = vcmp.gt.f32.partialorder %v92_v20, 0.0  ;;  %v139_v22 = vmul.f32 0.01, %v92_v20  ;;  %vm132_vm4 = vcmp.gt.f32.partialorder %v121_v21, 0.0  ;;  %v140_v23 = vmul.f32 0.01, %v121_v21 }
  0x99   :  { %159 = vst [vmem:[#allocation7] sm:$0xff] %v151_v18 }
  0x9a   :  { %160 = vst [vmem:[#allocation7 + $0x8] sm:$0xff] %v152_v19  ;;  %v147_v24 = vsel %vm131_vm3, %v92_v20, %v139_v22  ;;  %v148_v25 = vsel %vm132_vm4, %v121_v21, %v140_v23 }
  0x9b   :  { %v155_v26 = vadd.f32 %v147_v24, %v48_v2  ;;  %v156_v27 = vadd.f32 %v148_v25, %v49_v3  ;;  %v89_v28 = vpop.f32.mrf.mxu0  ;;  %v118_v29 = vpop.f32.mrf.mxu1 }
  0x9c   :  { %vm129_vm5 = vcmp.gt.f32.partialorder %v89_v28, 0.0  ;;  %v137_v30 = vmul.f32 0.01, %v89_v28  ;;  %vm130_vm6 = vcmp.gt.f32.partialorder %v118_v29, 0.0  ;;  %v138_v31 = vmul.f32 0.01, %v118_v29 }
  0x9d   :  { %163 = vst [vmem:[#allocation7 + $0x20] sm:$0xff] %v155_v26 }
  0x9e   :  { %164 = vst [vmem:[#allocation7 + $0x28] sm:$0xff] %v156_v27  ;;  %v145_v32 = vsel %vm129_vm5, %v89_v28, %v137_v30  ;;  %v146_v33 = vsel %vm130_vm6, %v118_v29, %v138_v31 }
  0x9f   :  { %v153_v34 = vadd.f32 %v145_v32, %v326_v4  ;;  %v154_v35 = vadd.f32 %v146_v33, %v47_v5  ;;  %v95_v36 = vpop.f32.mrf.mxu2  ;;  %v124_v37 = vpop.f32.mrf.mxu3 }
  0xa0   :  { %vm133_vm7 = vcmp.gt.f32.partialorder %v95_v36, 0.0  ;;  %v141_v38 = vmul.f32 0.01, %v95_v36  ;;  %vm134_vm8 = vcmp.gt.f32.partialorder %v124_v37, 0.0  ;;  %v142_v39 = vmul.f32 0.01, %v124_v37 }
  0xa1   :  { %161 = vst [vmem:[#allocation7 + $0x10] sm:$0xff] %v153_v34 }
  0xa2   :  { %162 = vst [vmem:[#allocation7 + $0x18] sm:$0xff] %v154_v35  ;;  %v149_v40 = vsel %vm133_vm7, %v95_v36, %v141_v38  ;;  %v150_v41 = vsel %vm134_vm8, %v124_v37, %v142_v39 }
  0xa3   :  { %v157_v42 = vadd.f32 %v149_v40, %v319_v0  ;;  %v158_v43 = vadd.f32 %v150_v41, %v321_v1 }
  0xa5   :  { %165 = vst [vmem:[#allocation7 + $0x30] sm:$0xff] %v157_v42 }
  0xa6   :  { %166 = vst [vmem:[#allocation7 + $0x38] sm:$0xff] %v158_v43 }
  0xa7   :  { %179 = dma.vmem_to_hbm [thread:$0]  %s172_s1, 1024, %s174_s25, [#allocation4], %s292_s21, %s292_s21, %s293_s22  }
  0xa8   :  { %286 = dma.done.wait [#allocation4], 1024  }
  0xa9   :  { %287 = vsyncadd [#allocation4], 4294966272 }
  0xaa   :  { %184 = vsyncpa [#allocation3], 1 }
  0xab   :  { %185 = vsyncpa [#allocation6], 1 }
  0xac   :  { %186 = vsyncpa [#allocation4], 1 }

</bundles_post_ra>
